<compile_context>
chip_gen: v6e
topology: v6e:2x2x1
jax: 0.10.0
libtpu: 0.0.40
codegen_flags: <defaults>
</compile_context>

<pallas_src>
import functools

import jax
import jax.numpy as jnp
import numpy as np
from jax.experimental import pallas as pl
from jax.experimental.pallas import tpu as pltpu

HEAD_DIM = 64
EPS = 1e-5


def _distill_kernel(sf_ref, tf_ref, m_ref, num_ref, den_ref, *, n_heads, head_dim):
    """Accumulate masked per-pixel head-L2 distance sums into resident outputs.

    sf_ref/tf_ref: (1, NC, hw_tile) feature blocks (source dtype, cast per-slice)
    m_ref:         (1, 1, hw_tile)  f32 {0,1} mask block
    num_ref/den_ref: (1, 1, 1, hw_tile) f32 output blocks, resident across the
                     HW grid axis (same block index for every h).
    """
    h = pl.program_id(2)

    @pl.when(h == 0)
    def _():
        num_ref[...] = jnp.zeros_like(num_ref)
        den_ref[...] = jnp.zeros_like(den_ref)

    hwt = m_ref.shape[-1]
    # Sum over heads of per-head L2 (the 1/n_heads mean is folded into the
    # wrapper-side finalize -> one fewer elementwise pass per tile).
    dist = jnp.zeros((1, hwt), jnp.float32)
    for n in range(n_heads):                       # static unroll; 64-sublane-aligned
        sl = pl.ds(n * head_dim, head_dim)
        d = (sf_ref[0, sl, :].astype(jnp.float32)
             - tf_ref[0, sl, :].astype(jnp.float32))        # (64, hwt) f32
        dist = dist + jnp.sqrt(jnp.sum(d * d, axis=0, keepdims=True))

    m = m_ref[0]                                   # (1, hwt) {0,1} f32
    # Lane-wide accumulation (plain VPU adds); cross-lane reduce happens once in
    # the wrapper on the tiny (B, n_split, 1, hw_tile) partials.
    num_ref[...] += (dist * m).reshape(1, 1, 1, hwt)
    den_ref[...] += m.reshape(1, 1, 1, hwt)


def _vmem_capacity_bytes():
    """Physical per-core VMEM (128 MiB v5e/v6e, 64 MiB v7x); safe fallback."""
    try:
        info = pltpu.get_tpu_info()
        cap = getattr(info, "vmem_capacity_bytes", None)
        if cap:
            return int(cap)
    except Exception:
        pass
    return 64 << 20  # conservative (v7x per-core size) if the query fails


def _choose_hw_tile(HW, NC, itemsize, budget_bytes, head_dim):
    """Largest lane-aligned spatial tile whose double-buffered feature blocks plus
    in-kernel f32 temporaries fit the VMEM budget."""
    # bytes per lane column: 2 feature inputs x 2 pipeline buffers + mask block
    # + per-head f32 temporaries (two casts / diff / square) + accumulators.
    per_lane = 2 * 2 * NC * itemsize + 2 * 4 + 4 * head_dim * 4 + 64
    max_tile = max(128, min(4096, (budget_bytes // per_lane) // 128 * 128))
    hw128 = -(-HW // 128) * 128
    if hw128 <= max_tile:
        return hw128                                  # one tile covers everything
    # Largest multiple-of-128 divisor of the 128-padded extent that fits.
    n128 = hw128 // 128
    best = 128
    d = 1
    while d * d <= n128:
        if n128 % d == 0:
            for q in (d, n128 // d):
                if q * 128 <= max_tile:
                    best = max(best, q * 128)
        d += 1
    if best >= min(512, max_tile):
        return best
    # Only tiny divisors exist (e.g. prime tile count): take a big tile and let
    # the wrapper pad HW up to a multiple of it (padded pixels are masked out).
    return max_tile


def teacher_distill_loss(student_features, teacher_features,
                         student_tokens, teacher_tokens, mask,
                         head_dim=HEAD_DIM, hw_tile=None, n_split=None):
    B, NC, H, W = student_features.shape
    C = head_dim
    assert NC % C == 0
    N = NC // C
    HW = H * W
    T = student_tokens.shape[1]

    cap = _vmem_capacity_bytes()
    feat_itemsize = jnp.dtype(student_features.dtype).itemsize
    if hw_tile is None:
        hw_tile = _choose_hw_tile(HW, NC, feat_itemsize, int(cap * 0.70), C)
    assert hw_tile % 128 == 0, f"hw_tile={hw_tile} must be lane aligned"

    HW_pad = -(-HW // hw_tile) * hw_tile
    n_hw_total = HW_pad // hw_tile
    # Optional parallel split of the HW reduction: keeps both v7x TensorCores
    # busy when B == 1 (harmless on single-TC v5e/v6e).
    if n_split is None:
        n_split = 2 if (B == 1 and n_hw_total >= 2 and n_hw_total % 2 == 0) else 1
    if n_hw_total % n_split != 0:
        n_split = 1
    n_hw_inner = n_hw_total // n_split

    # Native contiguous layout (free reshape): spatial on lanes, channels on sublanes.
    sf = student_features.reshape(B, NC, HW)
    tf = teacher_features.reshape(B, NC, HW)

    # mask: F.interpolate(mask.float()+0.001, (H,W), 'nearest') > 0.5  (index gather)
    Hm, Wm = mask.shape[-2:]
    mf = mask.astype(jnp.float32) + 0.001
    ri = (jnp.arange(H) * Hm // H).astype(jnp.int32)
    ci = (jnp.arange(W) * Wm // W).astype(jnp.int32)
    m01 = (mf[:, :, ri][:, :, :, ci] > 0.5).astype(jnp.float32).reshape(B, 1, HW)

    if HW_pad > HW:
        pad = HW_pad - HW
        sf = jnp.pad(sf, ((0, 0), (0, 0), (0, pad)))
        tf = jnp.pad(tf, ((0, 0), (0, 0), (0, pad)))
        m01 = jnp.pad(m01, ((0, 0), (0, 0), (0, pad)))   # zeros: padded pixels masked out

    kernel = functools.partial(_distill_kernel, n_heads=N, head_dim=C)

    feat_map = lambda b, s, h: (b, 0, s * n_hw_inner + h)
    out_map = lambda b, s, h: (b, s, 0, 0)

    cost = pl.CostEstimate(
        flops=int(3 * B * NC * HW_pad + 4 * B * HW_pad),
        transcendentals=int(B * N * HW_pad),
        bytes_accessed=int(2 * B * NC * HW_pad * feat_itemsize + B * HW_pad * 4
                           + 2 * B * n_split * hw_tile * 4),
    )

    num_part, den_part = pl.pallas_call(
        kernel,
        out_shape=(jax.ShapeDtypeStruct((B, n_split, 1, hw_tile), jnp.float32),
                   jax.ShapeDtypeStruct((B, n_split, 1, hw_tile), jnp.float32)),
        grid=(B, n_split, n_hw_inner),
        in_specs=[
            pl.BlockSpec((1, NC, hw_tile), feat_map),
            pl.BlockSpec((1, NC, hw_tile), feat_map),
            pl.BlockSpec((1, 1, hw_tile), feat_map),
        ],
        out_specs=(pl.BlockSpec((1, 1, 1, hw_tile), out_map),
                   pl.BlockSpec((1, 1, 1, hw_tile), out_map)),
        compiler_params=pltpu.CompilerParams(
            dimension_semantics=("parallel", "parallel", "arbitrary"),
            vmem_limit_bytes=int(cap * 0.90)),
        cost_estimate=cost,
    )(sf, tf, m01)

    # ---- finalize (negligible work, plain JAX) ----
    num = jnp.sum(num_part, axis=(1, 2, 3)) / N            # fold the 1/n_heads mean
    den = jnp.maximum(jnp.sum(den_part, axis=(1, 2, 3)), 1.0)
    loss_feat = jnp.sqrt(jnp.maximum(num / den, EPS))       # (B,)

    # ---- token branch: O(B*T*NC) elements, negligible HBM traffic -> plain JAX ----
    st = student_tokens.astype(jnp.float32).reshape(B, T, N, C)
    tt = teacher_tokens.astype(jnp.float32).reshape(B, T, N, C)
    dtok = jnp.mean(jnp.sqrt(jnp.sum((st - tt) ** 2, axis=-1)), axis=-1)   # (B, T)
    loss_tok = jnp.sqrt(jnp.maximum(dtok, EPS))

    if T == 1:
        return loss_feat + 0.01 * loss_tok[:, 0]
    return loss_feat[:, None] + 0.01 * loss_tok


def _reference(student_features, teacher_features, student_tokens,
               teacher_tokens, mask, head_dim=HEAD_DIM, eps=EPS):
    """Pure-JAX mirror of the PyTorch forward for verification."""
    B, NC, H, W = student_features.shape
    C = head_dim
    N = NC // C
    T = student_tokens.shape[1]

    Hm, Wm = mask.shape[-2:]
    mf = mask.astype(jnp.float32) + 0.001
    ri = jnp.arange(H) * Hm // H
    ci = jnp.arange(W) * Wm // W
    m = (mf[:, :, ri][:, :, :, ci] > 0.5).astype(jnp.float32)       # (B,1,H,W)

    sfe = student_features.reshape(B, N, C, H, W).astype(jnp.float32)
    tfe = teacher_features.reshape(B, N, C, H, W).astype(jnp.float32)
    dist = jnp.sqrt(jnp.sum((sfe - tfe) ** 2, axis=2))              # (B,N,H,W)
    dist = jnp.mean(dist, axis=1, keepdims=True)                    # (B,1,H,W)
    num = jnp.sum(dist * m, axis=(-2, -1))
    den = jnp.maximum(jnp.sum(m, axis=(-2, -1)), 1.0)
    loss_feat = jnp.sqrt(jnp.maximum(num / den, eps)).reshape(B)

    ste = student_tokens.reshape(B, T, N, C).astype(jnp.float32)
    tte = teacher_tokens.reshape(B, T, N, C).astype(jnp.float32)
    dtok = jnp.mean(jnp.sqrt(jnp.sum((ste - tte) ** 2, axis=-1)), axis=-1)  # (B,T)
    loss_tok = jnp.sqrt(jnp.maximum(dtok, eps))
    return loss_feat + 0.01 * (loss_tok[:, 0] if T == 1 else loss_tok)


if __name__ == "__main__":
    key = jax.random.PRNGKey(0)
    B, N, C, H, W, T = 2, 2, HEAD_DIM, 16, 16, 1
    NC = N * C
    k1, k2, k3, k4, k5 = jax.random.split(key, 5)

    student_features = jax.random.normal(k1, (B, NC, H, W), dtype=jnp.float32)
    teacher_features = jax.random.normal(k2, (B, NC, H, W), dtype=jnp.float32)
    student_tokens = jax.random.normal(k3, (B, T, NC), dtype=jnp.float32)
    teacher_tokens = jax.random.normal(k4, (B, T, NC), dtype=jnp.float32)
    mask = jax.random.bernoulli(k5, 0.7, (B, 1, 8, 8))   # lower-res bool mask

    ref = _reference(student_features, teacher_features,
                     student_tokens, teacher_tokens, mask)

    # Exercise: auto tile (single block), multi-tile accumulation, split-reduction.
    for kwargs in (dict(), dict(hw_tile=128), dict(hw_tile=128, n_split=2)):
        out = jax.block_until_ready(
            teacher_distill_loss(student_features, teacher_features,
                                 student_tokens, teacher_tokens, mask, **kwargs))
        np.testing.assert_allclose(np.asarray(out), np.asarray(ref),
                                   rtol=1e-4, atol=1e-5)

    print("KERNEL_OK")
</pallas_src>

<mosaic_0001>
module attributes {stable_mosaic.version = 11 : i64} {
  func.func @_distill_kernel(%arg0: i32, %arg1: i32, %arg2: i32, %arg3: memref<1x128x256xf32, #tpu.memory_space<vmem>>, %arg4: memref<1x128x256xf32, #tpu.memory_space<vmem>>, %arg5: memref<1x1x256xf32, #tpu.memory_space<vmem>>, %arg6: memref<1x1x1x256xf32, #tpu.memory_space<vmem>>, %arg7: memref<1x1x1x256xf32, #tpu.memory_space<vmem>>) attributes {dimension_semantics = [#tpu.dimension_semantics<parallel>, #tpu.dimension_semantics<parallel>, #tpu.dimension_semantics<arbitrary>], iteration_bounds = array<i64: 2, 1, 1>, scalar_prefetch = 0 : i64, scratch_operands = 0 : i64, tpu.core_type = #tpu.core_type<tc>, window_params = [{transform_indices = @transform_0, window_bounds = array<i64: 1, 128, 256>}, {transform_indices = @transform_1, window_bounds = array<i64: 1, 128, 256>}, {transform_indices = @transform_2, window_bounds = array<i64: 1, 1, 256>}, {transform_indices = @transform_3, window_bounds = array<i64: 1, 1, 1, 256>}, {transform_indices = @transform_4, window_bounds = array<i64: 1, 1, 1, 256>}]} {
    %c0_i32 = arith.constant 0 : i32
    %0 = arith.cmpi eq, %arg2, %c0_i32 : i32
    %1 = arith.extui %0 : i1 to i32
    %c0_i32_0 = arith.constant 0 : i32
    %2 = arith.cmpi ne, %1, %c0_i32_0 : i32
    scf.if %2 {
      %cst_32 = arith.constant 0.000000e+00 : f32
      %35 = vector.broadcast %cst_32 : f32 to vector<1x1x1x256xf32>
      %c0_33 = arith.constant 0 : index
      %c0_34 = arith.constant 0 : index
      %c0_35 = arith.constant 0 : index
      %c0_36 = arith.constant 0 : index
      %36 = vector.load %arg6[%c0_33, %c0_34, %c0_35, %c0_36] : memref<1x1x1x256xf32, #tpu.memory_space<vmem>>, vector<1x1x1x256xf32>
      tpu.vector_store %arg6[%c0_33, %c0_34, %c0_35, %c0_36], %35 {strides = array<i32>} : memref<1x1x1x256xf32, #tpu.memory_space<vmem>>, vector<1x1x1x256xf32>,
      %cst_37 = arith.constant 0.000000e+00 : f32
      %37 = vector.broadcast %cst_37 : f32 to vector<1x1x1x256xf32>
      %c0_38 = arith.constant 0 : index
      %c0_39 = arith.constant 0 : index
      %c0_40 = arith.constant 0 : index
      %c0_41 = arith.constant 0 : index
      %38 = vector.load %arg7[%c0_38, %c0_39, %c0_40, %c0_41] : memref<1x1x1x256xf32, #tpu.memory_space<vmem>>, vector<1x1x1x256xf32>
      tpu.vector_store %arg7[%c0_38, %c0_39, %c0_40, %c0_41], %37 {strides = array<i32>} : memref<1x1x1x256xf32, #tpu.memory_space<vmem>>, vector<1x1x1x256xf32>,
    } else {
    }
    %cst = arith.constant 0.000000e+00 : f32
    %3 = vector.broadcast %cst : f32 to vector<1x256xf32>
    %c0 = arith.constant 0 : index
    %c0_1 = arith.constant 0 : index
    %c0_2 = arith.constant 0 : index
    %4 = vector.load %arg3[%c0, %c0_1, %c0_2] : memref<1x128x256xf32, #tpu.memory_space<vmem>>, vector<1x64x256xf32>
    %5 = vector.shape_cast %4 : vector<1x64x256xf32> to vector<64x256xf32>
    %c0_3 = arith.constant 0 : index
    %c0_4 = arith.constant 0 : index
    %c0_5 = arith.constant 0 : index
    %6 = vector.load %arg4[%c0_3, %c0_4, %c0_5] : memref<1x128x256xf32, #tpu.memory_space<vmem>>, vector<1x64x256xf32>
    %7 = vector.shape_cast %6 : vector<1x64x256xf32> to vector<64x256xf32>
    %8 = arith.subf %5, %7 : vector<64x256xf32>
    %9 = arith.mulf %8, %8 : vector<64x256xf32>
    %cst_6 = arith.constant dense<0.000000e+00> : vector<256xf32>
    %10 = vector.multi_reduction <add>, %9, %cst_6 [0] : vector<64x256xf32> to vector<256xf32>
    %11 = vector.shape_cast %10 : vector<256xf32> to vector<1x256xf32>
    %12 = math.sqrt %11 : vector<1x256xf32>
    %13 = arith.addf %3, %12 : vector<1x256xf32>
    %c0_7 = arith.constant 0 : index
    %c64 = arith.constant 64 : index
    %c0_8 = arith.constant 0 : index
    %14 = vector.load %arg3[%c0_7, %c64, %c0_8] : memref<1x128x256xf32, #tpu.memory_space<vmem>>, vector<1x64x256xf32>
    %15 = vector.shape_cast %14 : vector<1x64x256xf32> to vector<64x256xf32>
    %c0_9 = arith.constant 0 : index
    %c64_10 = arith.constant 64 : index
    %c0_11 = arith.constant 0 : index
    %16 = vector.load %arg4[%c0_9, %c64_10, %c0_11] : memref<1x128x256xf32, #tpu.memory_space<vmem>>, vector<1x64x256xf32>
    %17 = vector.shape_cast %16 : vector<1x64x256xf32> to vector<64x256xf32>
    %18 = arith.subf %15, %17 : vector<64x256xf32>
    %19 = arith.mulf %18, %18 : vector<64x256xf32>
    %cst_12 = arith.constant dense<0.000000e+00> : vector<256xf32>
    %20 = vector.multi_reduction <add>, %19, %cst_12 [0] : vector<64x256xf32> to vector<256xf32>
    %21 = vector.shape_cast %20 : vector<256xf32> to vector<1x256xf32>
    %22 = math.sqrt %21 : vector<1x256xf32>
    %23 = arith.addf %13, %22 : vector<1x256xf32>
    %c0_13 = arith.constant 0 : index
    %c0_14 = arith.constant 0 : index
    %c0_15 = arith.constant 0 : index
    %24 = vector.load %arg5[%c0_13, %c0_14, %c0_15] : memref<1x1x256xf32, #tpu.memory_space<vmem>>, vector<1x1x256xf32>
    %25 = vector.shape_cast %24 : vector<1x1x256xf32> to vector<1x256xf32>
    %c0_16 = arith.constant 0 : index
    %c0_17 = arith.constant 0 : index
    %c0_18 = arith.constant 0 : index
    %c0_19 = arith.constant 0 : index
    %26 = vector.load %arg6[%c0_16, %c0_17, %c0_18, %c0_19] : memref<1x1x1x256xf32, #tpu.memory_space<vmem>>, vector<1x1x1x256xf32>
    %27 = arith.mulf %23, %25 : vector<1x256xf32>
    %28 = vector.shape_cast %27 : vector<1x256xf32> to vector<1x1x1x256xf32>
    %29 = arith.addf %26, %28 : vector<1x1x1x256xf32>
    %c0_20 = arith.constant 0 : index
    %c0_21 = arith.constant 0 : index
    %c0_22 = arith.constant 0 : index
    %c0_23 = arith.constant 0 : index
    %30 = vector.load %arg6[%c0_20, %c0_21, %c0_22, %c0_23] : memref<1x1x1x256xf32, #tpu.memory_space<vmem>>, vector<1x1x1x256xf32>
    tpu.vector_store %arg6[%c0_20, %c0_21, %c0_22, %c0_23], %29 {strides = array<i32>} : memref<1x1x1x256xf32, #tpu.memory_space<vmem>>, vector<1x1x1x256xf32>,
    %c0_24 = arith.constant 0 : index
    %c0_25 = arith.constant 0 : index
    %c0_26 = arith.constant 0 : index
    %c0_27 = arith.constant 0 : index
    %31 = vector.load %arg7[%c0_24, %c0_25, %c0_26, %c0_27] : memref<1x1x1x256xf32, #tpu.memory_space<vmem>>, vector<1x1x1x256xf32>
    %32 = vector.shape_cast %25 : vector<1x256xf32> to vector<1x1x1x256xf32>
    %33 = arith.addf %31, %32 : vector<1x1x1x256xf32>
    %c0_28 = arith.constant 0 : index
    %c0_29 = arith.constant 0 : index
    %c0_30 = arith.constant 0 : index
    %c0_31 = arith.constant 0 : index
    %34 = vector.load %arg7[%c0_28, %c0_29, %c0_30, %c0_31] : memref<1x1x1x256xf32, #tpu.memory_space<vmem>>, vector<1x1x1x256xf32>
    tpu.vector_store %arg7[%c0_28, %c0_29, %c0_30, %c0_31], %33 {strides = array<i32>} : memref<1x1x1x256xf32, #tpu.memory_space<vmem>>, vector<1x1x1x256xf32>,
    return
  }
  func.func @transform_0(%arg0: i32, %arg1: i32, %arg2: i32) -> (i32, i32, i32) {
    %c1_i32 = arith.constant 1 : i32
    %0 = arith.muli %arg1, %c1_i32 : i32
    %1 = arith.addi %0, %arg2 : i32
    %c0_i32 = arith.constant 0 : i32
    %c0_i32_0 = arith.constant 0 : i32
    return %arg0, %c0_i32, %1 : i32, i32, i32
  }
  func.func @transform_1(%arg0: i32, %arg1: i32, %arg2: i32) -> (i32, i32, i32) {
    %c1_i32 = arith.constant 1 : i32
    %0 = arith.muli %arg1, %c1_i32 : i32
    %1 = arith.addi %0, %arg2 : i32
    %c0_i32 = arith.constant 0 : i32
    %c0_i32_0 = arith.constant 0 : i32
    return %arg0, %c0_i32, %1 : i32, i32, i32
  }
  func.func @transform_2(%arg0: i32, %arg1: i32, %arg2: i32) -> (i32, i32, i32) {
    %c1_i32 = arith.constant 1 : i32
    %0 = arith.muli %arg1, %c1_i32 : i32
    %1 = arith.addi %0, %arg2 : i32
    %c0_i32 = arith.constant 0 : i32
    %c0_i32_0 = arith.constant 0 : i32
    return %arg0, %c0_i32, %1 : i32, i32, i32
  }
  func.func @transform_3(%arg0: i32, %arg1: i32, %arg2: i32) -> (i32, i32, i32, i32) {
    %c0_i32 = arith.constant 0 : i32
    %c0_i32_0 = arith.constant 0 : i32
    %c0_i32_1 = arith.constant 0 : i32
    return %arg0, %arg1, %c0_i32, %c0_i32_0 : i32, i32, i32, i32
  }
  func.func @transform_4(%arg0: i32, %arg1: i32, %arg2: i32) -> (i32, i32, i32, i32) {
    %c0_i32 = arith.constant 0 : i32
    %c0_i32_0 = arith.constant 0 : i32
    %c0_i32_1 = arith.constant 0 : i32
    return %arg0, %arg1, %c0_i32, %c0_i32_0 : i32, i32, i32, i32
  }
}

</mosaic_0001>

<bundles_post_ra>
// kernel: tpu_custom_call.1
= control target key start
LH: loop header
LB: loop body
LE: loop exit
PB: predicated region body
PF: predicated region fallthrough
CT: control target
= control target key end

     0   :  { %s1507_s0 = inlined_call_operand.hbm [shape: f32[2,128,256], index: 0, kind: input, shape index: {}]   ;;  %s1508_s1 = inlined_call_operand.hbm [shape: f32[2,128,256], index: 1, kind: input, shape index: {}]   ;;  %s1509_s2 = inlined_call_operand.hbm [shape: f32[2,1,256], index: 2, kind: input, shape index: {}]   ;;  %s1510_s3 = inlined_call_operand.hbm [shape: f32[2,1,1,256], index: 3, kind: output, shape index: {0}]   ;;  %s1511_s4 = inlined_call_operand.hbm [shape: f32[2,1,1,256], index: 4, kind: output, shape index: {1}]  }
   0x1   :  { %1516 = sst [smem:[#allocation19_spill]] %s1508_s1 }
   0x2   :  { %10 = vsyncpa [#allocation3], 0 }
   0x3   :  { %12 = vsyncpa [#allocation3 + $0x1], 0 }
   0x4   :  { %13 = vsyncpa [#allocation6], 0 }
   0x5   :  { %15 = vsyncpa [#allocation6 + $0x1], 0 }
   0x6   :  { %16 = vsyncpa [#allocation4], 0 }
   0x7   :  { %18 = vsyncpa [#allocation4 + $0x1], 0 }
   0x8   :  { %19 = vsyncpa [#allocation10], 0 }
   0x9   :  { %21 = vsyncpa [#allocation10 + $0x1], 0  ;;  %s1183_s15 = smov 0   ;;  %s1185_s16 = smov 0  }
   0xa   :  { %s1187_s17 = smov 0   ;;  %s1189_s18 = smov 0  }
   0xb   :  { %s1191_s19 = smov 0   ;;  %s1193_s20 = smov 0  }
   0xc LB: > { %1517 = sst [smem:[#allocation15_spill]] %s1135_s17  ;;  %s1214_s21 = sadd.s32 4294967295, %s1147_s20   ;;  %s1147_s20 = sphi %s1193_s20, %s27_s20   ;;  %s1143_s19 = sphi %s1191_s19, %s1538_s19   ;;  %s1139_s18 = sphi %s1189_s18, %s1537_s18   ;;  %s1135_s17 = sphi %s1187_s17, %s1533_s17   ;;  %s1131_s16 = sphi %s1185_s16, %s1536_s16   ;;  %s1127_s15 = sphi %s1183_s15, %s1535_s15  }
   0xd   : > { %1518 = sst [smem:[#allocation16_spill]] %s1147_s20  ;;  %s829_s22 = sadd.s32 4294967294, %s1147_s20  }
   0xe   : > { %s46_s23 = sadd.s32 1, %s1143_s19  ;;  %s57_s24 = sadd.s32 1, %s1135_s17 }
   0xf   : > { %p48_p0 = scmp.ge.s32.totalorder %s46_s23, 2  ;;  %p64_p1 = scmp.ne.s32.totalorder %s1135_s17, %s1131_s16 }
  0x10   : > { %p65_p2 = scmp.eq.s32.totalorder %s1147_s20, 0  ;;  %p70_p3 = scmp.ne.s32.totalorder %s1131_s16, %s1127_s15 }
  0x11   : > { %s1540_s23 = smov (%p48_p0, %s46_s23), 0  ;;  %p71_p5 = scmp.eq.s32.totalorder %s1214_s21, 0 }
  0x12   : > { %1519 = sst [smem:[#allocation17_spill]] %s1540_s23  ;;  %p1226_p4 = por %p65_p2, %p64_p1 }
  0x13   : > { %s52_s26 = ssub.s32 %s1143_s19, %s1540_s23  ;;  %p156_p6 = scmp.eq.s32.totalorder %s1214_s21, 1 }
  0x14   : > { %p55_p7 = scmp.eq.s32.totalorder %s52_s26, 0  ;;  %p1234_p8 = por %p71_p5, %p70_p3 }
  0x15   : > { %p1238_p9 = por %p156_p6, %p64_p1  ;;  %p162_p10 = scmp.eq.s32.totalorder %s829_s22, 1 }
  0x16   : > { %s1243_s29 = scalar_select %p55_p7, %s1135_s17, %s57_s24  }
  0x17   : > { %p1245_p11 = por %p162_p10, %p70_p3  ;;  %p887_p13 = scmp.lt.s32.totalorder %s1147_s20, 2 }
  0x18   : > { %1523 = sst [smem:[#allocation18_spill]] %s1243_s29  ;;  %s1252_s5 = sand.u32 1, %s1135_s17  }
  0x19   : > { %s832_s6 = sshll.u32 %s1252_s5, 8  ;;  %s855_s7 = sshll.u32 %s1143_s19, 12 }
  0x1a   : > { %p1258_p0 = pnand %p887_p13, %p1226_p4  ;;  %s234_s9 = sand.u32 1, %s1147_s20  }
  0x1b   : > { %s1526_s1 = sld [smem:[#allocation19_spill]]  ;;  %s238_s13 = scalar_lea.vmem [#allocation5], %s832_s6 }
  0x1c   : > { %s248_s14 = sshll.u32 %s238_s13, 4  ;;  %p841_p1 = scmp.ge.s32.totalorder %s1147_s20, 1  ;;  %s249_s14 = int_to_ptr.vmem [resolvable:$true] %s248_s14 }
  0x1d   : > { %p278_p2 = scmp.lt.s32.totalorder %s1147_s20, 3  ;;  %s1272_s22 = scalar_lea.sflag [#allocation6], %s234_s9 }
  0x1e   : > { %p951_p3 = pneg %p1258_p0  ;;  %s962_s24 = scalar_lea.vmem %s249_s14, 4096 }
  0x1f   : > { %p963_p4 = scmp.ne.s32.totalorder %s249_s14, %s962_s24  ;;  %s1149_s25 = smov [#allocation5]  }
  0x20   : > { %s967_s26 = sshll.u32 %s1149_s25, 4  ;;  %s968_s26 = int_to_ptr.vmem [resolvable:$false] %s967_s26 }
  0x21   : > { %s247_s12 = scalar_lea.hbm %s1526_s1, %s855_s7  ;;  %p965_p5 = pnand %p963_p4, %p951_p3 }
  0x22   : > { %s969_s10 = scalar_lea.vmem %s968_s26, 8192  ;;  %p970_p7 = scmp.lt.s32.totalorder %s249_s14, %s968_s26 }
  0x23   : > { %p966_p6 = pneg %p965_p5  ;;  %p971_p10 = scmp.lt.s32.totalorder %s969_s10, %s962_s24 }
  0x25   : > { %p972_p13 = por %p971_p10, %p970_p7 }
  0x27   : > { %p973_p12 = pnand %p972_p13, %p966_p6 }
  0x29   : > { %976 = shalt.err (!%p973_p12)
}
  0x2a   : > { %s1150_s11 = smov 256   ;;  %s1151_s9 = smov 16  }
  0x2b   : > { %876 = dma.hbm_to_vmem [thread:$0]  (!%p1258_p0), %s247_s12, 4096, %s249_s14, %s1272_s22, %s1150_s11, %s1150_s11, %s1151_s9  }
  0x2c   : > { %p1286_p4 = pnand %p841_p1, %p278_p2  ;;  %s223_s26 = scalar_lea.hbm %s1507_s0, %s855_s7 }
  0x2d   : > { %s214_s10 = scalar_lea.vmem [#allocation2], %s832_s6  ;;  %s838_s23 = sshll.u32 %s1252_s5, 1 }
  0x2e   : > { %s224_s1 = sshll.u32 %s214_s10, 4  ;;  %s211_s29 = scalar_lea.sflag [#allocation3], %s1252_s5  ;;  %s225_s1 = int_to_ptr.vmem [resolvable:$true] %s224_s1 }
  0x2f   : > { %s990_s17 = scalar_lea.vmem %s225_s1, 4096  ;;  %s1152_s12 = smov [#allocation2]  }
  0x30   : > { %p991_p12 = scmp.ne.s32.totalorder %s225_s1, %s990_s17  ;;  %s995_s14 = sshll.u32 %s1152_s12, 4  ;;  %s996_s14 = int_to_ptr.vmem [resolvable:$false] %s995_s14 }
  0x31   : > { %s997_s20 = scalar_lea.vmem %s996_s14, 8192  ;;  %p998_p2 = scmp.lt.s32.totalorder %s225_s1, %s996_s14 }
  0x32   : > { %p993_p5 = pnand %p991_p12, %p951_p3  ;;  %p999_p6 = scmp.lt.s32.totalorder %s997_s20, %s990_s17 }
  0x34   : > { %p994_p1 = pneg %p993_p5  ;;  %p1000_p7 = por %p999_p6, %p998_p2 }
  0x36   : > { %p1001_p10 = pnand %p1000_p7, %p994_p1 }
  0x38   : > { %1004 = shalt.err (!%p1001_p10)
}
  0x39   : > { %873 = dma.hbm_to_vmem [thread:$0]  (!%p1258_p0), %s223_s26, 4096, %s225_s1, %s211_s29, %s1150_s11, %s1150_s11, %s1151_s9  }
  0x3a   : > { %s857_s5 = sshll.u32 %s1143_s19, 5  ;;  %s262_s6 = scalar_lea.vmem [#allocation7], %s838_s23 }
  0x3b   : > { %s273_s7 = sshll.u32 %s262_s6, 4  ;;  %s271_s10 = scalar_lea.hbm %s1509_s2, %s857_s5  ;;  %s274_s7 = int_to_ptr.vmem [resolvable:$true] %s273_s7 }
  0x3c   : > { %s1018_s12 = scalar_lea.vmem %s274_s7, 32  ;;  %s1153_s17 = smov [#allocation7]  }
  0x3d   : > { %p1019_p13 = scmp.ne.s32.totalorder %s274_s7, %s1018_s12  ;;  %s1023_s20 = sshll.u32 %s1153_s17, 4  ;;  %s1024_s20 = int_to_ptr.vmem [resolvable:$false] %s1023_s20 }
  0x3e   : > { %s1025_s14 = scalar_lea.vmem %s1024_s20, 64  ;;  %p1026_p1 = scmp.lt.s32.totalorder %s274_s7, %s1024_s20 }
  0x3f   : > { %p1021_p12 = pnand %p1019_p13, %p951_p3  ;;  %p1027_p2 = scmp.lt.s32.totalorder %s1025_s14, %s1018_s12 }
  0x41   : > { %p1022_p5 = pneg %p1021_p12  ;;  %p1028_p6 = por %p1027_p2, %p1026_p1 }
  0x43   : > { %p1029_p7 = pnand %p1028_p6, %p1022_p5 }
  0x45   : > { %1032 = shalt.err (!%p1029_p7)
}
  0x46   : > { %879 = dma.hbm_to_vmem [thread:$0]  (!%p1258_p0), %s271_s10, 32, %s274_s7, %s1272_s22  }
  0x47   : > { %282 = sbr.rel (%p1286_p4) target bundleno = 182 (0xb6), region = 32  ;;  %s1317_s1 = sand.u32 (!%p1286_p4), 1, %s1131_s16  }
  0x48   : > { %s842_s23 = sshll.u32 (!%p1286_p4), %s1317_s1, 8  ;;  %s285_s29 = scalar_lea.sflag (!%p1286_p4), [#allocation3], %s1317_s1 }
  0x49   : > { %s1321_s11 = scalar_lea.vmem (!%p1286_p4), [#allocation2], %s842_s23 }
  0x4c   : > { %1110 = dma.done.wait (%p1234_p8), %s285_s29, 4096  }
  0x4d   : > { %1112 = vsyncadd (%p1234_p8), %s285_s29, 4294963200  ;;  %s293_s8 = sand.u32 1, %s1214_s21   ;;  %s1328_s9 = scalar_lea.vmem [#allocation5], %s842_s23 }
  0x4e   : > { %s294_s22 = scalar_lea.sflag [#allocation6], %s293_s8 }
  0x4f   : > { %1114 = dma.done.wait (%p1234_p8), %s294_s22, 4128  }
  0x50   : > { %1116 = vsyncadd (%p1234_p8), %s294_s22, 4294963168  ;;  %s1335_s13 = sshll.u32 %s1317_s1, 1  ;;  %v356_v0 = vlaneseq  ;;  %v1154_v2 = vmov 0.0   ;;  %v362_v3 = vld [vmem:[%s1321_s11] sm:$0xff]  ;;  %v363_v4 = vld [vmem:[%s1321_s11 + $0x8] sm:$0xff]  ;;  %s858_s26 = sshll.u32 %s1139_s18, 5 }
  0x51   : > { %s1343_s21 = scalar_lea.vmem [#allocation8], %s1335_s13  ;;  %s1349_s27 = scalar_lea.vmem [#allocation9], %s1335_s13  ;;  %v364_v5 = vld [vmem:[%s1321_s11 + $0x10] sm:$0xff]  ;;  %v365_v6 = vld [vmem:[%s1321_s11 + $0x18] sm:$0xff]  ;;  %v366_v7 = vld [vmem:[%s1321_s11 + $0x20] sm:$0xff] }
  0x52   : > { %vm1338_vm0 = vcmp.lt.s32.totalorder %v356_v0, 256  ;;  %v367_v8 = vld [vmem:[%s1321_s11 + $0x28] sm:$0xff]  ;;  %v378_v9 = vld [vmem:[%s1328_s9] sm:$0xff]  ;;  %v380_v11 = vld [vmem:[%s1328_s9 + $0x10] sm:$0xff]  ;;  %s654_s5 = sshll.u32 %s1349_s27, 4  ;;  %s306_s6 = scalar_lea.vmem [#allocation7], %s1335_s13  ;;  %s1430_s5 = int_to_ptr.vmem [resolvable:$true] %s654_s5 }
  0x53   : > { %360 = vst.msk [vmem:[%s1343_s21] sm:$0x3] %vm1338_vm0, %v1154_v2  ;;  %361 = vst.msk [vmem:[%s1349_s27] sm:$0x3] %vm1338_vm0, %v1154_v2  ;;  %v379_v10 = vld [vmem:[%s1328_s9 + $0x8] sm:$0xff]  ;;  %v381_v12 = vld [vmem:[%s1328_s9 + $0x18] sm:$0xff]  ;;  %v394_v14 = vsub.f32 %v362_v3, %v378_v9  ;;  %v396_v19 = vsub.f32 %v364_v5, %v380_v11  ;;  %s1428_s25 = scalar_lea.hbm %s1511_s4, %s858_s26 }
  0x54   : > { %v382_v13 = vld [vmem:[%s1328_s9 + $0x20] sm:$0xff]  ;;  %v368_v15 = vld [vmem:[%s1321_s11 + $0x30] sm:$0xff]  ;;  %v383_v16 = vld [vmem:[%s1328_s9 + $0x28] sm:$0xff]  ;;  %v395_v18 = vsub.f32 %v363_v4, %v379_v10  ;;  %v397_v20 = vsub.f32 %v365_v6, %v381_v12  ;;  %s622_s10 = scalar_lea.sflag [#allocation10], %s1317_s1  ;;  %s1033_s12 = scalar_lea.vmem %s1430_s5, 32 }
  0x55   : > { %v384_v17 = vld [vmem:[%s1328_s9 + $0x30] sm:$0xff]  ;;  %v369_v21 = vld [vmem:[%s1321_s11 + $0x38] sm:$0xff]  ;;  %v398_v23 = vsub.f32 %v366_v7, %v382_v13  ;;  %v370_v24 = vld [vmem:[%s1321_s11 + $0x40] sm:$0xff]  ;;  %v399_v26 = vsub.f32 %v367_v8, %v383_v16  ;;  %v410_v30 = vmul.f32 %v394_v14, %v394_v14  ;;  %v412_v31 = vmul.f32 %v396_v19, %v396_v19  ;;  %p1034_p8 = scmp.ne.s32.totalorder %s1430_s5, %s1033_s12  ;;  %s1155_s17 = smov [#allocation9]  }
  0x56   : > { %v385_v22 = vld [vmem:[%s1328_s9 + $0x38] sm:$0xff]  ;;  %v386_v25 = vld [vmem:[%s1328_s9 + $0x40] sm:$0xff]  ;;  %v371_v27 = vld [vmem:[%s1321_s11 + $0x48] sm:$0xff]  ;;  %v400_v29 = vsub.f32 %v368_v15, %v384_v17  ;;  %v411_v35 = vmul.f32 %v395_v18, %v395_v18  ;;  %v413_v36 = vmul.f32 %v397_v20, %v397_v20  ;;  %s1037_s20 = sshll.u32 %s1155_s17, 4  ;;  %s1038_s20 = int_to_ptr.vmem [resolvable:$false] %s1037_s20 }
  0x57   : > { %v387_v28 = vld [vmem:[%s1328_s9 + $0x48] sm:$0xff]  ;;  %v372_v32 = vld [vmem:[%s1321_s11 + $0x50] sm:$0xff]  ;;  %v401_v34 = vsub.f32 %v369_v21, %v385_v22  ;;  %v373_v37 = vld [vmem:[%s1321_s11 + $0x58] sm:$0xff]  ;;  %v402_v40 = vsub.f32 %v370_v24, %v386_v25  ;;  %v414_v41 = vmul.f32 %v398_v23, %v398_v23  ;;  %v415_v46 = vmul.f32 %v399_v26, %v399_v26  ;;  %p1035_p0 = pnand %p1034_p8, %p1238_p9  ;;  %s1039_s14 = scalar_lea.vmem %s1038_s20, 64 }
  0x58   : > { %v388_v33 = vld [vmem:[%s1328_s9 + $0x50] sm:$0xff]  ;;  %v374_v38 = vld [vmem:[%s1321_s11 + $0x60] sm:$0xff]  ;;  %v389_v39 = vld [vmem:[%s1328_s9 + $0x58] sm:$0xff]  ;;  %v403_v45 = vsub.f32 %v371_v27, %v387_v28  ;;  %v416_v51 = vmul.f32 %v400_v29, %v400_v29  ;;  %v426_v52 = vadd.f32 %v412_v31, %v410_v30  ;;  %v439_v56 = vadd.f32 %v413_v36, %v411_v35  ;;  %p1040_p4 = scmp.lt.s32.totalorder %s1430_s5, %s1038_s20  ;;  %p1041_p10 = scmp.lt.s32.totalorder %s1039_s14, %s1033_s12 }
  0x59   : > { %v375_v42 = vld [vmem:[%s1321_s11 + $0x68] sm:$0xff]  ;;  %v376_v43 = vld [vmem:[%s1321_s11 + $0x70] sm:$0xff]  ;;  %v390_v44 = vld [vmem:[%s1328_s9 + $0x60] sm:$0xff]  ;;  %v404_v50 = vsub.f32 %v372_v32, %v388_v33  ;;  %v405_v54 = vsub.f32 %v373_v37, %v389_v39  ;;  %v417_v55 = vmul.f32 %v401_v34, %v401_v34  ;;  %v418_v60 = vmul.f32 %v402_v40, %v402_v40  ;;  %p1036_p3 = pneg %p1035_p0 }
  0x5a   : > { %v377_v47 = vld [vmem:[%s1321_s11 + $0x78] sm:$0xff]  ;;  %v391_v48 = vld [vmem:[%s1328_s9 + $0x68] sm:$0xff]  ;;  %v392_v49 = vld [vmem:[%s1328_s9 + $0x70] sm:$0xff]  ;;  %v406_v59 = vsub.f32 %v374_v38, %v390_v44  ;;  %v427_v61 = vadd.f32 %v426_v52, %v414_v41  ;;  %v419_v4 = vmul.f32 %v403_v45, %v403_v45  ;;  %v440_v5 = vadd.f32 %v439_v56, %v415_v46  ;;  %p1042_p13 = por %p1041_p10, %p1040_p4 }
  0x5b   : > { %v393_v53 = vld [vmem:[%s1328_s9 + $0x78] sm:$0xff]  ;;  %v468_v57 = vld [vmem:[%s1321_s11 + $0x80] sm:$0xff]  ;;  %v469_v58 = vld [vmem:[%s1321_s11 + $0x88] sm:$0xff]  ;;  %v407_v3 = vsub.f32 %v375_v42, %v391_v48  ;;  %v408_v9 = vsub.f32 %v376_v43, %v392_v49  ;;  %v420_v11 = vmul.f32 %v404_v50, %v404_v50  ;;  %v421_v15 = vmul.f32 %v405_v54, %v405_v54 }
  0x5c   : > { %v470_v62 = vld [vmem:[%s1321_s11 + $0x90] sm:$0xff]  ;;  %v484_v63 = vld [vmem:[%s1328_s9 + $0x80] sm:$0xff]  ;;  %v471_v6 = vld [vmem:[%s1321_s11 + $0x98] sm:$0xff]  ;;  %v409_v10 = vsub.f32 %v377_v47, %v393_v53  ;;  %v428_v12 = vadd.f32 %v427_v61, %v416_v51  ;;  %v441_v16 = vadd.f32 %v440_v5, %v417_v55  ;;  %v422_v21 = vmul.f32 %v406_v59, %v406_v59  ;;  %p1043_p12 = pnand %p1042_p13, %p1036_p3 }
  0x5d   : > { %v486_v2 = vld [vmem:[%s1328_s9 + $0x90] sm:$0xff]  ;;  %v485_v7 = vld [vmem:[%s1328_s9 + $0x88] sm:$0xff]  ;;  %v487_v8 = vld [vmem:[%s1328_s9 + $0x98] sm:$0xff]  ;;  %v500_v19 = vsub.f32 %v468_v57, %v484_v63  ;;  %v423_v27 = vmul.f32 %v407_v3, %v407_v3  ;;  %v424_v32 = vmul.f32 %v408_v9, %v408_v9 }
  0x5e   : > { %v472_v13 = vld [vmem:[%s1321_s11 + $0xa0] sm:$0xff]  ;;  %v473_v17 = vld [vmem:[%s1321_s11 + $0xa8] sm:$0xff]  ;;  %v502_v20 = vsub.f32 %v470_v62, %v486_v2  ;;  %v429_v22 = vadd.f32 %v428_v12, %v418_v60  ;;  %v474_v23 = vld [vmem:[%s1321_s11 + $0xb0] sm:$0xff]  ;;  %v501_v25 = vsub.f32 %v469_v58, %v485_v7  ;;  %v503_v26 = vsub.f32 %v471_v6, %v487_v8 }
  0x5f   : > { %v488_v14 = vld [vmem:[%s1328_s9 + $0xa0] sm:$0xff]  ;;  %v489_v18 = vld [vmem:[%s1328_s9 + $0xa8] sm:$0xff]  ;;  %v490_v24 = vld [vmem:[%s1328_s9 + $0xb0] sm:$0xff]  ;;  %v442_v28 = vadd.f32 %v441_v16, %v419_v4  ;;  %v425_v33 = vmul.f32 %v409_v10, %v409_v10  ;;  %v516_v44 = vmul.f32 %v500_v19, %v500_v19 }
  0x60   : > { %v475_v29 = vld [vmem:[%s1321_s11 + $0xb8] sm:$0xff]  ;;  %v504_v31 = vsub.f32 %v472_v13, %v488_v14  ;;  %v430_v34 = vadd.f32 %v429_v22, %v420_v11  ;;  %v476_v35 = vld [vmem:[%s1321_s11 + $0xc0] sm:$0xff]  ;;  %v477_v36 = vld [vmem:[%s1321_s11 + $0xc8] sm:$0xff]  ;;  %v505_v38 = vsub.f32 %v473_v17, %v489_v18  ;;  %v506_v43 = vsub.f32 %v474_v23, %v490_v24 }
  0x61   : > { %v491_v30 = vld [vmem:[%s1328_s9 + $0xb8] sm:$0xff]  ;;  %v492_v37 = vld [vmem:[%s1328_s9 + $0xc0] sm:$0xff]  ;;  %v443_v39 = vadd.f32 %v442_v28, %v421_v15  ;;  %v478_v40 = vld [vmem:[%s1321_s11 + $0xd0] sm:$0xff]  ;;  %v518_v45 = vmul.f32 %v502_v20, %v502_v20  ;;  %v517_v50 = vmul.f32 %v501_v25, %v501_v25  ;;  %v519_v51 = vmul.f32 %v503_v26, %v503_v26 }
  0x62   : > { %v493_v41 = vld [vmem:[%s1328_s9 + $0xc8] sm:$0xff]  ;;  %v494_v42 = vld [vmem:[%s1328_s9 + $0xd0] sm:$0xff]  ;;  %v431_v46 = vadd.f32 %v430_v34, %v422_v21  ;;  %v479_v47 = vld [vmem:[%s1321_s11 + $0xd8] sm:$0xff]  ;;  %v507_v49 = vsub.f32 %v475_v29, %v491_v30  ;;  %v508_v55 = vsub.f32 %v476_v35, %v492_v37  ;;  %v520_v56 = vmul.f32 %v504_v31, %v504_v31 }
  0x63   : > { %v495_v48 = vld [vmem:[%s1328_s9 + $0xd8] sm:$0xff]  ;;  %v444_v52 = vadd.f32 %v443_v39, %v423_v27  ;;  %v480_v53 = vld [vmem:[%s1321_s11 + $0xe0] sm:$0xff]  ;;  %v509_v58 = vsub.f32 %v477_v36, %v493_v41  ;;  %v510_v59 = vsub.f32 %v478_v40, %v494_v42  ;;  %v521_v60 = vmul.f32 %v505_v38, %v505_v38  ;;  %v613_v61 = vld [vmem:[%s1349_s27] sm:$0x3] }
  0x64   : > { %v496_v54 = vld [vmem:[%s1328_s9 + $0xe0] sm:$0xff]  ;;  %v432_v57 = vadd.f32 %v431_v46, %v424_v32  ;;  %v481_v63 = vld [vmem:[%s1321_s11 + $0xe8] sm:$0xff]  ;;  %v511_v3 = vsub.f32 %v479_v47, %v495_v48  ;;  %v522_v4 = vmul.f32 %v506_v43, %v506_v43  ;;  %v532_v5 = vadd.f32 %v518_v45, %v516_v44  ;;  %v482_v7 = vld [vmem:[%s1321_s11 + $0xf0] sm:$0xff] }
  0x65   : > { %v445_v62 = vadd.f32 %v444_v52, %v425_v33  ;;  %v497_v2 = vld [vmem:[%s1328_s9 + $0xe8] sm:$0xff]  ;;  %v498_v8 = vld [vmem:[%s1328_s9 + $0xf0] sm:$0xff]  ;;  %v512_v9 = vsub.f32 %v480_v53, %v496_v54  ;;  %v523_v10 = vmul.f32 %v507_v49, %v507_v49  ;;  %v545_v11 = vadd.f32 %v519_v51, %v517_v50  ;;  %v1420_v12 = vld [vmem:[%s306_s6] sm:$0x3] }
  0x66   : > { %v433_v6 = vrot.slane %v432_v57, 4  ;;  %v524_v14 = vmul.f32 %v508_v55, %v508_v55  ;;  %v533_v15 = vadd.f32 %v532_v5, %v520_v56  ;;  %v614_v16 = vadd.f32 %v613_v61, %v1420_v12  ;;  %v483_v22 = vld [vmem:[%s1321_s11 + $0xf8] sm:$0xff] }
  0x67   : > { %v446_v13 = vrot.slane %v445_v62, 4  ;;  %v513_v18 = vsub.f32 %v481_v63, %v497_v2  ;;  %v525_v19 = vmul.f32 %v509_v58, %v509_v58  ;;  %v546_v20 = vadd.f32 %v545_v11, %v521_v60  ;;  %v499_v23 = vld [vmem:[%s1328_s9 + $0xf8] sm:$0xff] }
  0x68   : > { %v434_v17 = vadd.f32 %v433_v6, %v432_v57  ;;  %v514_v24 = vsub.f32 %v482_v7, %v498_v8  ;;  %v526_v25 = vmul.f32 %v510_v59, %v510_v59  ;;  %v534_v26 = vadd.f32 %v533_v15, %v522_v4  ;;  %615 = vst.msk [vmem:[%s1349_s27] sm:$0x3] %vm1338_vm0, %v614_v16 }
  0x69   : > { %v447_v21 = vadd.f32 %v446_v13, %v445_v62  ;;  %v527_v28 = vmul.f32 %v511_v3, %v511_v3  ;;  %v547_v29 = vadd.f32 %v546_v20, %v523_v10 }
  0x6a   : > { %v435_v27 = vrot.slane %v434_v17, 2 }
  0x6b   : > { %1046 = shalt.err (!%p1043_p12)
}
  0x6c   : > { %s1047_s23 = scalar_lea.hbm %s1428_s25, 32  ;;  %s1051_s8 = scalar_lea.hbm %s1511_s4, 64 }
  0x6d   : > { %p1048_p5 = scmp.ne.s32.totalorder %s1428_s25, %s1047_s23  ;;  %p1052_p6 = scmp.lt.s32.totalorder %s1428_s25, %s1511_s4 }
  0x6e   : > { %p1053_p7 = scmp.lt.s32.totalorder %s1051_s8, %s1047_s23 }
  0x6f   : > { %p1049_p1 = pnand %p1048_p5, %p1238_p9 }
  0x70   : > { %p1054_p8 = por %p1053_p7, %p1052_p6 }
  0x71   : > { %p1050_p2 = pneg %p1049_p1 }
  0x73   : > { %p1055_p0 = pnand %p1054_p8, %p1050_p2 }
  0x75   : > { %1058 = shalt.err (!%p1055_p0)
}
  0x76   : > { %867 = dma.vmem_to_hbm [thread:$0]  (%p1238_p9), %s1430_s5, 32, %s1428_s25, %s622_s10   ;;  %v448_v30 = vrot.slane %v447_v21, 2  ;;  %v528_v31 = vmul.f32 %v512_v9, %v512_v9  ;;  %v535_v32 = vadd.f32 %v534_v26, %v524_v14  ;;  %v436_v33 = vadd.f32 %v435_v27, %v434_v17 }
  0x77   : > { %v515_v34 = vsub.f32 %v483_v22, %v499_v23  ;;  %v529_v35 = vmul.f32 %v513_v18, %v513_v18  ;;  %v548_v36 = vadd.f32 %v547_v29, %v525_v19  ;;  %v530_v37 = vmul.f32 %v514_v24, %v514_v24  ;;  %s638_s13 = sshll.u32 %s1343_s21, 4  ;;  %s636_s6 = scalar_lea.hbm %s1510_s3, %s858_s26  ;;  %s639_s13 = int_to_ptr.vmem [resolvable:$true] %s638_s13 }
  0x78   : > { %v536_v38 = vadd.f32 %v535_v32, %v526_v25  ;;  %v449_v39 = vadd.f32 %v448_v30, %v447_v21  ;;  %v437_v42 = vrot.slane %v436_v33, 1  ;;  %v578_v3 = vshrl.u32 %v356_v0, 7  ;;  %s617_s7 = scalar_lea.sflag [#allocation4], %s1317_s1  ;;  %s1059_s24 = scalar_lea.vmem %s639_s13, 32 }
  0x79   : > { %v549_v40 = vadd.f32 %v548_v36, %v527_v28  ;;  %v531_v43 = vmul.f32 %v515_v34, %v515_v34  ;;  %v1156_v8 = vmov 1966171168   ;;  %p1060_p3 = scmp.ne.s32.totalorder %s639_s13, %s1059_s24  ;;  %s1157_s25 = smov [#allocation8]  }
  0x7a   : > { %v537_v41 = vadd.f32 %v536_v38, %v528_v31  ;;  %v450_v46 = vrot.slane %v449_v39, 1  ;;  %v438_v47 = vadd.f32 %v437_v42, %v436_v33  ;;  %v579_v7 = vsub.s32 0, %v578_v3  ;;  %s1063_s10 = sshll.u32 %s1157_s25, 4  ;;  %s1064_s10 = int_to_ptr.vmem [resolvable:$false] %s1063_s10 }
  0x7b   : > { %v550_v44 = vadd.f32 %v549_v40, %v529_v35  ;;  %v593_v9 = vunpack.c.l.s4 %v1156_v8  ;;  %v583_v14 = vsub.s32 1, %v578_v3  ;;  %v575_v35 = vld [vmem:[%s1343_s21] sm:$0x3]  ;;  %p1061_p4 = pnand %p1060_p3, %p1238_p9  ;;  %s1065_s12 = scalar_lea.vmem %s1064_s10, 64 }
  0x7c   : > { %v538_v45 = vadd.f32 %v537_v41, %v530_v37  ;;  %v451_v50 = vadd.f32 %v450_v46, %v449_v39  ;;  %941 = vrsqrt.f32 %v438_v47  ;;  %vm454_vm1 = vcmp.eq.f32.partialorder %v438_v47, inf  ;;  %p1066_p13 = scmp.lt.s32.totalorder %s639_s13, %s1064_s10  ;;  %p1067_p12 = scmp.lt.s32.totalorder %s1065_s12, %s1059_s24 }
  0x7d   : > { %v551_v49 = vadd.f32 %v550_v44, %v531_v43  ;;  %v457_v5 = vand.u32 2147483648, %v438_v47  ;;  %vm456_vm3 = vcmp.eq.f32.partialorder %v438_v47, 0.0  ;;  %v580_v21 = vrot.slane %v1420_v12, %v579_v7  ;;  %p1062_p10 = pneg %p1061_p4 }
  0x7e   : > { %v539_v48 = vrot.slane %v538_v45, 4  ;;  %943 = vrsqrt.f32 %v451_v50  ;;  %vm461_vm2 = vcmp.eq.f32.partialorder %v451_v50, inf  ;;  %v464_v11 = vand.u32 2147483648, %v451_v50  ;;  %p1068_p5 = por %p1067_p12, %p1066_p13 }
  0x7f   : > { %v552_v52 = vrot.slane %v551_v49, 4  ;;  %vm463_vm5 = vcmp.eq.f32.partialorder %v451_v50, 0.0  ;;  %v584_v26 = vrot.slane %v1420_v12, %v583_v14  ;;  %v594_v27 = vunpack.c.0.s8 %v593_v9 }
  0x80   : > { %v540_v51 = vadd.f32 %v539_v48, %v538_v45  ;;  %p1069_p1 = pnand %p1068_p5, %p1062_p10 }
  0x81   : > { %v553_v54 = vadd.f32 %v552_v52, %v551_v49  ;;  %v597_v32 = vsub.s32 %v594_v27, %v578_v3 }
  0x82   : > { %v541_v53 = vrot.slane %v540_v51, 2 }
  0x83   : > { %v554_v56 = vrot.slane %v553_v54, 2 }
  0x84   : > { %v542_v55 = vadd.f32 %v541_v53, %v540_v51 }
  0x85   : > { %v555_v58 = vadd.f32 %v554_v56, %v553_v54 }
  0x86   : > { %v543_v57 = vrot.slane %v542_v55, 1 }
  0x87   : > { %v556_v60 = vrot.slane %v555_v58, 1 }
  0x88   : > { %v544_v59 = vadd.f32 %v543_v57, %v542_v55 }
  0x89   : > { %v557_v61 = vadd.f32 %v556_v60, %v555_v58  ;;  %v942_v62 = vpop.eup %941 }
  0x8a   : > { %945 = vrsqrt.f32 %v544_v59  ;;  %v453_v2 = vmul.f32 %v942_v62, %v438_v47  ;;  %vm560_vm4 = vcmp.eq.f32.partialorder %v544_v59, inf  ;;  %v563_v13 = vand.u32 2147483648, %v544_v59 }
  0x8b   : > { %947 = vrsqrt.f32 %v557_v61  ;;  %v944_v63 = vpop.eup %943  ;;  %vm562_vm6 = vcmp.eq.f32.partialorder %v544_v59, 0.0  ;;  %vm567_vm7 = vcmp.eq.f32.partialorder %v557_v61, inf  ;;  %v570_v18 = vand.u32 2147483648, %v557_v61 }
  0x8c   : > { %v460_v4 = vmul.f32 %v944_v63, %v451_v50  ;;  %v455_v6 = vsel %vm454_vm1, %v438_v47, %v453_v2  ;;  %vm569_vm8 = vcmp.eq.f32.partialorder %v557_v61, 0.0 }
  0x8d   : > { %v458_v0 = vsel %vm456_vm3, %v457_v5, %v455_v6 }
  0x8e   : > { %v462_v15 = vsel %vm461_vm2, %v451_v50, %v460_v4 }
  0x8f   : > { %v465_v22 = vsel %vm463_vm5, %v464_v11, %v462_v15 }
  0x97   : > { %v946_v10 = vpop.eup %945 }
  0x98   : > { %v559_v16 = vmul.f32 %v946_v10, %v544_v59  ;;  %v948_v17 = vpop.eup %947 }
  0x99   : > { %v566_v20 = vmul.f32 %v948_v17, %v557_v61 }
  0x9a   : > { %v561_v19 = vsel %vm560_vm4, %v544_v59, %v559_v16 }
  0x9b   : > { %v564_v23 = vsel %vm562_vm6, %v563_v13, %v561_v19  ;;  %v568_v24 = vsel %vm567_vm7, %v557_v61, %v566_v20 }
  0x9c   : > { %v572_v25 = vadd.f32 %v564_v23, %v458_v0  ;;  %v571_v28 = vsel %vm569_vm8, %v570_v18, %v568_v24 }
  0x9d   : > { %v573_v29 = vadd.f32 %v571_v28, %v465_v22 }
  0x9e   : > { %v587_v30 = vmul.f32 %v580_v21, %v572_v25 }
  0x9f   : > { %v588_v31 = vmul.f32 %v584_v26, %v573_v29 }
  0xa1   : > { %v591_v33 = vcombine.low %v587_v30, %v588_v31 }
  0xa3   : > { %v598_v34 = vrot.slane %v591_v33, %v597_v32 }
  0xa5   : > { %v605_v36 = vrot.slane %v598_v34, %v597_v32 }
  0xa7   : > { %v607_v37 = vadd.f32 %v605_v36, %v575_v35 }
  0xa9   : > { %612 = vst.msk [vmem:[%s1343_s21] sm:$0x3] %vm1338_vm0, %v607_v37 }
  0xaa   : > { %1072 = shalt.err (!%p1069_p1)
}
  0xab   : > { %s1073_s18 = scalar_lea.hbm %s636_s6, 32  ;;  %s1077_s26 = scalar_lea.hbm %s1510_s3, 64 }
  0xac   : > { %p1074_p2 = scmp.ne.s32.totalorder %s636_s6, %s1073_s18  ;;  %p1078_p8 = scmp.lt.s32.totalorder %s636_s6, %s1510_s3 }
  0xad   : > { %p1079_p0 = scmp.lt.s32.totalorder %s1077_s26, %s1073_s18 }
  0xae   : > { %p1075_p6 = pnand %p1074_p2, %p1238_p9 }
  0xaf   : > { %p1080_p3 = por %p1079_p0, %p1078_p8 }
  0xb0   : > { %p1076_p7 = pneg %p1075_p6 }
  0xb2   : > { %p1081_p4 = pnand %p1080_p3, %p1076_p7 }
  0xb4   : > { %1084 = shalt.err (!%p1081_p4)
}
  0xb5   : > { %866 = dma.vmem_to_hbm [thread:$0]  (%p1238_p9), %s639_s13, 32, %s636_s6, %s617_s7  }
  0xb6 PF: > { %s1530_s14 = sld [smem:[#allocation16_spill]]  ;;  %s666_s23 = sand.u32 1, %s1127_s15  }
  0xb7   : > { %s667_s29 = scalar_lea.sflag [#allocation4], %s666_s23 }
  0xbc   : > { %p1531_p10 = scmp.ge.s32.totalorder %s1530_s14, 2 }
  0xbe   : > { %p881_p13 = pnand %p1531_p10, %p1245_p11 }
  0xc0   : > { %p882_p12 = pneg %p881_p13 }
  0xc2   : > { %1118 = dma.done.wait (%p882_p12), %s667_s29, 32  }
  0xc3   : > { %1120 = vsyncadd (%p882_p12), %s667_s29, 4294967264  ;;  %s676_s11 = scalar_lea.sflag [#allocation10], %s666_s23 }
  0xc4   : > { %1122 = dma.done.wait (%p882_p12), %s676_s11, 32  }
  0xc5   : > { %1124 = vsyncadd (%p882_p12), %s676_s11, 4294967264  ;;  %s27_s20 = sadd.s32 1, %s1530_s14   ;;  %s1532_s28 = sld [smem:[#allocation15_spill]] }
  0xc6   : > { %p24_p5 = scmp.ge.s32.totalorder %s27_s20, 4   ;;  %s1533_s17 = sld [smem:[#allocation18_spill]] }
  0xc7   : > { %s1534_s8 = sld [smem:[#allocation17_spill]]  ;;  %s1535_s15 = smov %s1131_s16 }
  0xc8   : > { %s1537_s18 = smov %s1143_s19 }
  0xc9   :  { %26 = sbr.rel (!%p24_p5) target bundleno = 12 (0xc), region = 122 }
  0xcb   : > { %s1536_s16 = smov %s1532_s28 }
  0xcd   : > { %s1538_s19 = smov %s1534_s8 }
  0xce   :  { %681 = vsyncpa [#allocation3], 1 }
  0xcf   :  { %683 = vsyncpa [#allocation3 + $0x1], 1 }
  0xd0   :  { %684 = vsyncpa [#allocation6], 1 }
  0xd1   :  { %686 = vsyncpa [#allocation6 + $0x1], 1 }
  0xd2   :  { %687 = vsyncpa [#allocation4], 1 }
  0xd3   :  { %689 = vsyncpa [#allocation4 + $0x1], 1 }
  0xd4   :  { %690 = vsyncpa [#allocation10], 1 }
  0xd5   :  { %692 = vsyncpa [#allocation10 + $0x1], 1 }

</bundles_post_ra>
